<compile_context>
chip_gen: v7x
topology: tpu7x:2x2x1
jax: 0.10.0
libtpu: 0.0.40
codegen_flags: <defaults>
</compile_context>

<pallas_src>
import math
from functools import lru_cache

import numpy as np
import jax
import jax.numpy as jnp
from jax.experimental import pallas as pl
from jax.experimental.pallas import tpu as pltpu


_GRAY_W = (0.2989, 0.587, 0.114)

# op ids used in the SMEM jitter schedule (match torchvision fn_idx encoding)
_OP_BRIGHTNESS, _OP_CONTRAST, _OP_SATURATION, _OP_HUE, _OP_NOOP = 0, 1, 2, 3, 4


# ----------------------------------------------------------------------------
# Kernel 1: pixel-sum "hash" reduction  (get_image_hash)
# ----------------------------------------------------------------------------
def _sum_kernel(x_ref, s_ref):
    s_ref[0, 0] = jnp.sum(x_ref[...])


@lru_cache(maxsize=None)
def _build_pixel_sum(shape):
    del shape  # jit caches per abstract shape; lru_cache keeps the callable stable
    return jax.jit(pl.pallas_call(
        _sum_kernel,
        out_shape=jax.ShapeDtypeStruct((1, 1), jnp.float32),
        in_specs=[pl.BlockSpec(memory_space=pltpu.MemorySpace.VMEM)],
        out_specs=pl.BlockSpec(memory_space=pltpu.MemorySpace.SMEM),
    ))


def pixel_sum(img):
    return _build_pixel_sum(tuple(img.shape))(img)


# ----------------------------------------------------------------------------
# In-kernel helpers (elementwise VPU/EUP/XLU work)
# ----------------------------------------------------------------------------
def _gray(r, g, b):
    return _GRAY_W[0] * r + _GRAY_W[1] * g + _GRAY_W[2] * b


def _clip01(x):
    return jnp.clip(x, 0.0, 1.0)


def _adjust_hue(r, g, b, hue_factor):
    # torchvision _rgb2hsv -> hue shift -> _hsv2rgb.
    # Divisions replaced by EUP reciprocals; %6 replaced by compare/select.
    maxc = jnp.maximum(jnp.maximum(r, g), b)
    minc = jnp.minimum(jnp.minimum(r, g), b)
    eqc = maxc == minc
    cr = maxc - minc
    ones = jnp.ones_like(maxc)
    s = cr * pl.reciprocal(jnp.where(eqc, ones, maxc), approx=True)
    inv_crd = pl.reciprocal(jnp.where(eqc, ones, cr), approx=True)
    rc = (maxc - r) * inv_crd
    gc = (maxc - g) * inv_crd
    bc = (maxc - b) * inv_crd
    hr = jnp.where(maxc == r, bc - gc, 0.0)
    hg = jnp.where((maxc == g) & (maxc != r), 2.0 + rc - bc, 0.0)
    hb = jnp.where((maxc != g) & (maxc != r), 4.0 + gc - rc, 0.0)
    h = (hr + hg + hb) * (1.0 / 6.0) + 1.0
    h = h - jnp.floor(h)                 # fmod(.., 1.0) for positive input
    h = h + hue_factor
    h = h - jnp.floor(h)                 # (h + f) % 1.0
    v = maxc
    h6 = h * 6.0
    i_f = jnp.floor(h6)
    f = h6 - i_f
    i = i_f.astype(jnp.int32)
    i = jnp.where(i >= 6, i - 6, i)      # handles h6 rounding up to exactly 6.0
    p = _clip01(v * (1.0 - s))
    q = _clip01(v * (1.0 - s * f))
    t = _clip01(v * (1.0 - s * (1.0 - f)))
    a_r = (v, q, p, p, t, v)
    a_g = (t, v, v, q, p, p)
    a_b = (p, p, t, v, v, q)
    zero = jnp.zeros_like(v)
    r_new, g_new, b_new = zero, zero, zero
    for k in range(6):
        sel = i == k
        r_new = r_new + jnp.where(sel, a_r[k], 0.0)
        g_new = g_new + jnp.where(sel, a_g[k], 0.0)
        b_new = b_new + jnp.where(sel, a_b[k], 0.0)
    return r_new, g_new, b_new


# ----------------------------------------------------------------------------
# Kernel 2 (fused): crop + bilinear resize (+hflip folded into Wx^T) on the MXU,
# followed by SMEM-scheduled color jitter + optional grayscale, in-place on the
# output VMEM block.  Compiled once per (H, W, S); all randomness is data.
# ----------------------------------------------------------------------------
def _make_fused_kernel(H, W, S):
    del W, S  # only H is needed for the static per-channel row slices

    def kernel(op_ref, fac_ref, gray_ref, img_ref, wy_ref, wxt_ref, out_ref):
        # ---- resize: one big (3H, W) @ (W, S) dot, then per-channel (S,H)@(H,S)
        x = img_ref[...].astype(jnp.bfloat16)                         # (3H, W)
        t = jnp.dot(x, wxt_ref[...],
                    preferred_element_type=jnp.float32)               # (3H, S)
        t = t.astype(jnp.bfloat16)
        wy = wy_ref[...]                                              # (S, H) bf16
        for c in range(3):
            out_ref[c] = jnp.dot(wy, t[c * H:(c + 1) * H, :],
                                 preferred_element_type=jnp.float32)  # (S, S) f32

        # ---- color jitter: 4 steps scheduled from SMEM (op id + factor) ----
        for step in range(4):
            op = op_ref[step]
            factor = fac_ref[step]

            @pl.when(op == _OP_BRIGHTNESS)
            def _():
                out_ref[...] = _clip01(factor * out_ref[...])

            @pl.when(op == _OP_CONTRAST)
            def _():
                mean = jnp.mean(_gray(out_ref[0], out_ref[1], out_ref[2]))
                out_ref[...] = _clip01(factor * out_ref[...]
                                       + (1.0 - factor) * mean)

            @pl.when(op == _OP_SATURATION)
            def _():
                r, g, b = out_ref[0], out_ref[1], out_ref[2]
                gray = _gray(r, g, b)
                out_ref[0] = _clip01(factor * r + (1.0 - factor) * gray)
                out_ref[1] = _clip01(factor * g + (1.0 - factor) * gray)
                out_ref[2] = _clip01(factor * b + (1.0 - factor) * gray)

            @pl.when(op == _OP_HUE)
            def _():
                r, g, b = _adjust_hue(out_ref[0], out_ref[1], out_ref[2], factor)
                out_ref[0] = r
                out_ref[1] = g
                out_ref[2] = b

        # ---- optional rgb_to_grayscale (flag from SMEM) ----
        @pl.when(gray_ref[0] == 1)
        def _():
            gray = _gray(out_ref[0], out_ref[1], out_ref[2])
            out_ref[0] = gray
            out_ref[1] = gray
            out_ref[2] = gray

    return kernel


@lru_cache(maxsize=None)
def _build_fused(H, W, S):
    call = pl.pallas_call(
        _make_fused_kernel(H, W, S),
        out_shape=jax.ShapeDtypeStruct((3, S, S), jnp.float32),
        in_specs=[
            pl.BlockSpec(memory_space=pltpu.MemorySpace.SMEM),   # op ids   (4,)
            pl.BlockSpec(memory_space=pltpu.MemorySpace.SMEM),   # factors  (4,)
            pl.BlockSpec(memory_space=pltpu.MemorySpace.SMEM),   # gray flag(1,)
            pl.BlockSpec(memory_space=pltpu.MemorySpace.VMEM),   # img (3H, W) f32
            pl.BlockSpec(memory_space=pltpu.MemorySpace.VMEM),   # wy  (S, H)  bf16
            pl.BlockSpec(memory_space=pltpu.MemorySpace.VMEM),   # wxt (W, S)  bf16
        ],
        out_specs=pl.BlockSpec(memory_space=pltpu.MemorySpace.VMEM),
    )
    # TODO(synk): for very large images on v7x (64 MiB VMEM) the whole-array
    # blocks should be row-tiled with a grid; fine for augmentation-sized inputs.
    return jax.jit(call)


def _bilinear_weight_matrix(crop_start, crop_size, full_in, out_size, flip=False):
    """torchvision/ATen bilinear (align_corners=False) interpolation matrix."""
    W = np.zeros((out_size, full_in), dtype=np.float32)
    scale = crop_size / out_size
    for o in range(out_size):
        src = scale * (o + 0.5) - 0.5
        src = max(src, 0.0)
        i0 = int(math.floor(src))
        i0 = min(i0, crop_size - 1)
        i1 = i0 + (1 if i0 < crop_size - 1 else 0)
        lam = src - i0
        W[o, crop_start + i0] += (1.0 - lam)
        W[o, crop_start + i1] += lam
    if flip:
        W = W[::-1].copy()
    return W


# ----------------------------------------------------------------------------
# Host-side parameter generation (mirrors the torch module's random logic,
# driven deterministically by NumPy instead of torch.manual_seed).
# ----------------------------------------------------------------------------
def _check_input(value, center=1.0, bound=(0.0, float("inf")), clip_first_on_zero=True):
    value = [center - float(value), center + float(value)]
    if clip_first_on_zero:
        value[0] = max(value[0], 0.0)
    if value[0] == value[1] == center:
        return None
    return value


def _get_crop_params(rng, height, width, scale, ratio):
    area = height * width
    log_ratio = (math.log(ratio[0]), math.log(ratio[1]))
    for _ in range(10):
        target_area = area * rng.uniform(scale[0], scale[1])
        aspect_ratio = math.exp(rng.uniform(log_ratio[0], log_ratio[1]))
        w = int(round(math.sqrt(target_area * aspect_ratio)))
        h = int(round(math.sqrt(target_area / aspect_ratio)))
        if 0 < w <= width and 0 < h <= height:
            i = int(rng.randint(0, height - h + 1))
            j = int(rng.randint(0, width - w + 1))
            return i, j, h, w
    in_ratio = float(width) / float(height)
    if in_ratio < min(ratio):
        w = width
        h = int(round(w / min(ratio)))
    elif in_ratio > max(ratio):
        h = height
        w = int(round(h * max(ratio)))
    else:
        w = width
        h = height
    i = (height - h) // 2
    j = (width - w) // 2
    return i, j, h, w


def rand_augment_fixed_num_augs(img, size, color_jitter, num_augs):
    """Forward pass of RandAugmentFixedNumAugs.  img: (3, H, W) float32 in [0,1]."""
    C, H, W = img.shape
    assert C == 3

    brightness = _check_input(color_jitter[0])
    contrast = _check_input(color_jitter[1])
    saturation = _check_input(color_jitter[2])
    hue = _check_input(color_jitter[3], center=0.0, bound=(-0.5, 0.5),
                       clip_first_on_zero=False)

    # --- image hash (Pallas reduction kernel) + seed derivation ---
    # TODO(synk): torch hashes raw PIL uint8 bytes; we hash the f32 pixel sum,
    # and this device->host sync is inherent to host-side parameter selection
    # for a single image (batch the hashes up-front to hide it in a pipeline).
    img_hash = int(float(pixel_sum(img)[0, 0]))
    aug_num = int(np.random.randint(0, num_augs))
    seed = (img_hash + aug_num) % (2 ** 31 - 1)
    rng = np.random.RandomState(seed)

    # --- random resized crop parameters ---
    i, j, h, w = _get_crop_params(rng, H, W, (0.08, 1.0), (3.0 / 4.0, 4.0 / 3.0))

    # --- horizontal flip coin (folded into the column interpolation matrix) ---
    do_flip = bool(rng.rand() < 0.5)

    # crop/flip live in the weight matrices (device DATA, shapes stay static).
    # TODO(synk): torchvision on PIL uses PIL's resampler; we implement the
    #             tensor-path bilinear (align_corners=False) semantics.
    wy = jnp.asarray(_bilinear_weight_matrix(i, h, H, size, flip=False)
                     ).astype(jnp.bfloat16)                                  # (S, H)
    wx = _bilinear_weight_matrix(j, w, W, size, flip=do_flip)                # (S, W)
    wxt = jnp.asarray(np.ascontiguousarray(wx.T)).astype(jnp.bfloat16)       # (W, S)

    # --- color jitter schedule (op id + factor per step, NOOP-padded) ---
    op_ids = [_OP_NOOP] * 4
    factors = [1.0] * 4
    if rng.rand() < 0.8:
        fn_idx = rng.permutation(4)
        b = None if brightness is None else float(rng.uniform(brightness[0], brightness[1]))
        c = None if contrast is None else float(rng.uniform(contrast[0], contrast[1]))
        s = None if saturation is None else float(rng.uniform(saturation[0], saturation[1]))
        hu = None if hue is None else float(rng.uniform(hue[0], hue[1]))
        factors_by_op = (b, c, s, hu)
        step = 0
        for fn_id in fn_idx:
            if factors_by_op[int(fn_id)] is not None:
                op_ids[step] = int(fn_id)
                factors[step] = float(factors_by_op[int(fn_id)])
                step += 1

    # --- grayscale coin ---
    do_gray = bool(rng.rand() < 0.2)

    # --- single fused Pallas kernel: resize(+flip) + jitter + grayscale ---
    fused = _build_fused(H, W, size)
    out = fused(
        jnp.asarray(op_ids, dtype=jnp.int32),
        jnp.asarray(factors, dtype=jnp.float32),
        jnp.asarray([1 if do_gray else 0], dtype=jnp.int32),
        img.reshape(3 * H, W),
        wy, wxt,
    )

    # F.to_tensor: image is already a float CHW tensor in [0, 1].
    return out, aug_num


# ----------------------------------------------------------------------------
if __name__ == "__main__":
    np.random.seed(0)  # drives np.random.randint(0, num_augs) deterministically
    key = jax.random.PRNGKey(0)
    x = jax.random.uniform(key, (3, 16, 16), dtype=jnp.float32)  # RGB, CHW, [0,1]

    out, aug_num = rand_augment_fixed_num_augs(
        x, size=16, color_jitter=(0.4, 0.4, 0.4, 0.1), num_augs=4
    )
    out = jax.block_until_ready(out)
    assert out.shape == (3, 16, 16) and out.dtype == jnp.float32
    assert bool(jnp.all(jnp.isfinite(out)))

    # A second image with different random params reuses the SAME compiled kernel
    # (no per-image Mosaic recompile: factors/order/flags are SMEM data).
    x2 = jax.random.uniform(jax.random.PRNGKey(1), (3, 16, 16), dtype=jnp.float32)
    out2, _ = rand_augment_fixed_num_augs(
        x2, size=16, color_jitter=(0.4, 0.4, 0.4, 0.1), num_augs=4
    )
    out2 = jax.block_until_ready(out2)
    assert out2.shape == (3, 16, 16) and bool(jnp.all(jnp.isfinite(out2)))

    print("KERNEL_OK")
</pallas_src>

<mosaic_0001>
module attributes {stable_mosaic.version = 11 : i64} {
  func.func @_sum_kernel(%arg0: memref<3x16x16xf32, #tpu.memory_space<vmem>>, %arg1: memref<1x1xf32, #tpu.memory_space<smem>>) attributes {dimension_semantics = [], scalar_prefetch = 0 : i64, scratch_operands = 0 : i64, tpu.core_type = #tpu.core_type<tc>} {
    %c0 = arith.constant 0 : index
    %c0_0 = arith.constant 0 : index
    %c0_1 = arith.constant 0 : index
    %0 = vector.load %arg0[%c0, %c0_0, %c0_1] : memref<3x16x16xf32, #tpu.memory_space<vmem>>, vector<3x16x16xf32>
    %1 = vector.shape_cast %0 : vector<3x16x16xf32> to vector<1x3x16x16xf32>
    %cst = arith.constant dense<0.000000e+00> : vector<1xf32>
    %2 = vector.multi_reduction <add>, %1, %cst [1, 2, 3] : vector<1x3x16x16xf32> to vector<1xf32>
    %3 = vector.shape_cast %2 : vector<1xf32> to vector<1x1x1x1xf32>
    %4 = vector.extract %3[0, 0, 0, 0] : f32 from vector<1x1x1x1xf32>
    %c0_2 = arith.constant 0 : index
    %c0_3 = arith.constant 0 : index
    %5 = memref.load %arg1[%c0_2, %c0_3] : memref<1x1xf32, #tpu.memory_space<smem>>
    memref.store %4, %arg1[%c0_2, %c0_3] : memref<1x1xf32, #tpu.memory_space<smem>>
    return
  }
}

</mosaic_0001>

<bundles_post_ra>
// kernel: tpu_custom_call.1
= control target key start
LH: loop header
LB: loop body
LE: loop exit
PB: predicated region body
PF: predicated region fallthrough
CT: control target
= control target key end

     0   :  { %6 = vsyncpa [#allocation3], 0  ;;  %s146_s0 = inlined_call_operand.hbm [shape: f32[3,16,16], index: 0, kind: input, shape index: {}]   ;;  %s147_s1 = inlined_call_operand.hbm [shape: f32[1,1], index: 1, kind: output, shape index: {}]  }
   0x1   :  { %7 = vsyncpa [#allocation4], 0  ;;  %s108_s6 = smov [#allocation2]   ;;  %s72_s10 = scalar_lea.hbm %s146_s0, 768 }
   0x2   :  { %s13_s7 = sshll.u32 %s108_s6, 4  ;;  %p73_p0 = scmp.ne.s32.totalorder %s146_s0, %s72_s10  ;;  %s14_s7 = int_to_ptr.vmem [resolvable:$true] %s13_s7 }
   0x3   :  { %p76_p1 = scmp.lt.u32.totalorder %s72_s10, %s146_s0 }
   0x5   :  { %p78_p2 = pnand %p76_p1, %p73_p0 }
   0x7   :  { %81 = shalt.err (!%p78_p2)
}
   0x8   :  { %s82_s15 = scalar_lea.vmem %s14_s7, 768  ;;  %p87_p4 = scmp.lt.s32.totalorder %s14_s7, %s14_s7 }
   0x9   :  { %p83_p3 = scmp.ne.s32.totalorder %s14_s7, %s82_s15  ;;  %p88_p5 = scmp.lt.s32.totalorder %s82_s15, %s82_s15 }
   0xb   :  { %p89_p6 = por %p88_p5, %p87_p4 }
   0xd   :  { %p90_p7 = pnand %p89_p6, %p83_p3 }
   0xf   :  { %93 = shalt.err (!%p90_p7)
}
  0x10   :  { %s109_s16 = smov 128   ;;  %s110_s17 = smov 8  }
  0x11   :  { %19 = dma.hbm_to_vmem [thread:$0]  %s146_s0, 768, %s14_s7, [#allocation3], %s109_s16, %s109_s16, %s110_s17  }
  0x12   :  { %104 = dma.done.wait [#allocation3], 768  }
  0x13   :  { %105 = vsyncadd [#allocation3], 4294966528  ;;  %vm29_vm0 = vcmask 130048   ;;  %v23_v0 = vld [vmem:[#allocation2] sm:$0xff]  ;;  %v24_v1 = vld [vmem:[#allocation2 + $0x8] sm:$0xff]  ;;  %s94_s22 = scalar_lea.hbm %s147_s1, 16 }
  0x14   :  { %v25_v2 = vld [vmem:[#allocation2 + $0x10] sm:$0xff]  ;;  %v26_v3 = vld [vmem:[#allocation2 + $0x18] sm:$0xff]  ;;  %v30_v4 = vsel %vm29_vm0, %v23_v0, 0.0  ;;  %v31_v5 = vsel %vm29_vm0, %v24_v1, 0.0  ;;  %v27_v7 = vld [vmem:[#allocation2 + $0x20] sm:$0xff]  ;;  %p95_p8 = scmp.ne.s32.totalorder %s147_s1, %s94_s22  ;;  %p98_p9 = scmp.lt.u32.totalorder %s94_s22, %s147_s1 }
  0x15   :  { %v33_v6 = vsel %vm29_vm0, %v25_v2, 0.0  ;;  %v32_v8 = vadd.f32 %v31_v5, %v30_v4  ;;  %v35_v9 = vsel %vm29_vm0, %v26_v3, 0.0  ;;  %v28_v10 = vld [vmem:[#allocation2 + $0x28] sm:$0xff]  ;;  %v37_v12 = vsel %vm29_vm0, %v27_v7, 0.0 }
  0x16   :  { %v39_v14 = vsel %vm29_vm0, %v28_v10, 0.0  ;;  %p100_p10 = pnand %p98_p9, %p95_p8 }
  0x17   :  { %v34_v11 = vadd.f32 %v33_v6, %v32_v8 }
  0x19   :  { %v36_v13 = vadd.f32 %v35_v9, %v34_v11 }
  0x1b   :  { %v38_v15 = vadd.f32 %v37_v12, %v36_v13 }
  0x1d   :  { %v40_v16 = vadd.f32 %v39_v14, %v38_v15 }
  0x1f   :  { %41 = vadd.xlane.f32.xlu0 %v40_v16 }
  0xac   :  { %v42_v17 = vpop.xlane.xlu0 %41 }
  0xad   :  { %v43_v18 = vrot.slane %v42_v17, 4 }
  0xaf   :  { %v44_v19 = vadd.f32 %v43_v18, %v42_v17 }
  0xb1   :  { %v45_v20 = vrot.slane %v44_v19, 2 }
  0xb3   :  { %v46_v21 = vadd.f32 %v45_v20, %v44_v19 }
  0xb5   :  { %v47_v22 = vrot.slane %v46_v21, 1 }
  0xb7   :  { %v48_v23 = vadd.f32 %v47_v22, %v46_v21 }
  0xb9   :  { %66 = vpush %v48_v23 }
  0xea   :  { %s67_s0 = spop %66 }
  0xeb   :  { %51 = sst [smem:[#allocation5]] %s67_s0 }
  0xec   :  { %103 = shalt.err (!%p100_p10)
}
  0xed   :  { %s111_s27 = smov [#allocation5]  }
  0xee   :  { %59 = dma.smem_to_hbm %s111_s27, 16, %s147_s1, [#allocation4]  }
  0xef   :  { %106 = dma.done.wait [#allocation4], 16  }
  0xf0   :  { %107 = vsyncadd [#allocation4], 4294967280 }
  0xf1   :  { %63 = sfence }
  0xf2   :  { %64 = vsyncpa [#allocation3], 1 }
  0xf3   :  { %65 = vsyncpa [#allocation4], 1 }

</bundles_post_ra>
